<compile_context>
chip_gen: v6e
topology: v6e:2x2x1
jax: 0.10.0
libtpu: 0.0.40
codegen_flags: <defaults>
</compile_context>

<pallas_src>
import math
from functools import partial

import jax
import jax.numpy as jnp
from jax.experimental import pallas as pl
from jax.experimental.pallas import tpu as pltpu


def _num_tensorcores():
    """Best-effort query of TensorCores per chip; defaults to 1 (no split)."""
    try:
        info = pltpu.get_tpu_info()
        for attr in ("num_tensorcores", "tensorcore_count", "num_cores",
                     "core_count"):
            v = getattr(info, attr, None)
            if isinstance(v, int) and v > 0:
                return v
    except Exception:
        pass
    try:
        v = getattr(jax.devices()[0], "num_cores", None)
        if isinstance(v, int) and v > 0:
            return v
    except Exception:
        pass
    return 1


def _node_euler_kernel(x0_ref, aff_ref, dt_ref, w1z_ref, w15_ref, b15_ref,
                       w2_ref, b2_ref, out_ref, z_ref, *, single_chunk):
    """Integrates one chunk of Euler steps for one batch tile.

    x0_ref:  (TB, D)      initial state tile
    aff_ref: (TC, H)      per-step fc1 affine rows: t_{g-1}*W1[:,0] + b1
                          (row 0 of chunk 0 is a dummy; dt there is 0)
    dt_ref:  (TC, 1)      per-step dt (0 for dummy/padded steps)
    w1z_ref: (D, H)       fc1 weight (transposed) for the state features
    w15_ref: (H, H), b15_ref: (1, H), w2_ref: (H, D), b2_ref: (1, D)
    out_ref: (TB, TC*D)   lane-contiguous trajectory slab for this chunk
    z_ref:   (TB, D) f32  carry scratch across chunk iterations
    """
    D = x0_ref.shape[1]
    TC = aff_ref.shape[0]

    # Hoist every loop-invariant load / slice out of the Euler chain.
    w1z = w1z_ref[...]
    w1z_rows = [w1z[d:d + 1, :] for d in range(D)]        # each (1, H)
    w15 = w15_ref[...]
    b15 = b15_ref[...]
    w2 = w2_ref[...]
    b2 = b2_ref[...]

    if single_chunk:
        # One chunk covers the full time grid: step 0 is just the IC.
        z = x0_ref[...].astype(jnp.float32)
        out_ref[:, 0:D] = z.astype(out_ref.dtype)
        start = 1
    else:
        tc = pl.program_id(1)

        @pl.when(tc == 0)
        def _():
            z_ref[...] = x0_ref[...].astype(jnp.float32)

        z = z_ref[...]
        start = 0      # row 0 of chunk 0 has dt == 0 -> identity step == IC

    for i in range(start, TC):
        aff = aff_ref[i:i + 1, :]          # (1, H)
        dtv = dt_ref[i:i + 1, :]           # (1, 1)
        # fc1(concat([t, z], 1)) = aff + sum_d z[:, d] * W1[:, 1+d]   (VPU)
        pre = aff
        for d in range(D):
            pre = pre + z[:, d:d + 1] * w1z_rows[d]
        h1 = jnp.tanh(pre)
        h2 = jnp.tanh(
            jnp.dot(h1, w15, preferred_element_type=jnp.float32) + b15)
        dz = jnp.dot(h2, w2, preferred_element_type=jnp.float32) + b2
        z = z + dtv * dz                   # Euler update (identity if dt==0)
        out_ref[:, i * D:(i + 1) * D] = z.astype(out_ref.dtype)

    if not single_chunk:
        z_ref[...] = z                     # carry to the next chunk


def node_forward(trajectories, ti, params, augment_dim=0, extrap=0):
    """Pallas equivalent of NODE.forward(trajectories, ti) (euler method)."""
    t = jnp.reshape(ti, (-1,)).astype(jnp.float32)         # torch.flatten(ti)
    T = int(t.shape[0])

    x0 = trajectories[:, -1, :] if extrap else trajectories[:, 0, :]
    B = int(x0.shape[0])
    if augment_dim > 0:
        x0 = jnp.concatenate(
            [x0, jnp.zeros((B, augment_dim), x0.dtype)], axis=1)
    D = int(x0.shape[1])
    out_dtype = x0.dtype

    W1, b1, W15, b15, W2, b2 = params
    H = int(W1.shape[0])

    # --- time chunking: all in-kernel indices stay static -------------------
    UNROLL_T = 32
    if T <= UNROLL_T:
        TC, n_chunks = T, 1
    else:
        m = 128 // math.gcd(D, 128)        # lane alignment of the out block
        TC = m
        while TC < UNROLL_T or TC % 8 != 0:
            TC += m
        n_chunks = -(-T // TC)
    T_pad = TC * n_chunks

    # Precompute per-step fc1 affine rows and dt.  Row g drives Euler step g;
    # row 0 (and end-padding rows) carry dt = 0 so those steps are identity.
    W1f = W1.astype(jnp.float32)
    aff_core = t[:-1, None] * W1f[:, 0][None, :] + b1.astype(jnp.float32)[None, :]
    dt_core = (t[1:] - t[:-1])[:, None].astype(jnp.float32)
    aff_p = jnp.zeros((T_pad, H), jnp.float32).at[1:T].set(aff_core)
    dt_p = jnp.zeros((T_pad, 1), jnp.float32).at[1:T].set(dt_core)

    # torch nn.Linear stores weight as [out_features, in_features]; pass
    # transposed weights so the kernel does x @ W.
    w1z = W1f[:, 1:].T                                   # (D, H)
    w15t = W15.T.astype(jnp.float32)                     # (H, H)
    b15r = b15.reshape(1, H).astype(jnp.float32)
    w2t = W2.T.astype(jnp.float32)                       # (H, D)
    b2r = b2.reshape(1, D).astype(jnp.float32)

    # Batch split across TensorCores only when the chip actually has >1 TC.
    TB = B
    if _num_tensorcores() >= 2 and B >= 16 and B % 16 == 0:
        TB = B // 2
    grid = (B // TB, n_chunks)

    def _whole(shape):
        n = len(shape)
        return pl.BlockSpec(shape, lambda b, c: (0,) * n)

    n_evals = (T - 1) if n_chunks == 1 else T_pad
    flops = n_evals * (2 * B * D * H + 2 * B * H * H + 2 * B * H * D)
    transcendentals = n_evals * 2 * B * H
    bytes_accessed = 4 * (B * T_pad * D + B * D + T_pad * (H + 1)
                          + D * H + H * H + H + H * D + D)

    # VMEM sizing: only raise the scoped limit when the blocks actually need
    # it (never triggers at small shapes; stays inside v7x's 64 MiB VMEM).
    block_bytes = 4 * (2 * TB * TC * D + 2 * TB * D + 2 * TC * (H + 1)
                       + 2 * (D * H + H * H + H + H * D + D) + TB * D)
    cp_kwargs = dict(dimension_semantics=("parallel", "arbitrary"))
    if block_bytes > (28 << 20):
        cp_kwargs["vmem_limit_bytes"] = int(min(block_bytes + (4 << 20),
                                                60 << 20))

    out_flat = pl.pallas_call(
        partial(_node_euler_kernel, single_chunk=(n_chunks == 1)),
        out_shape=jax.ShapeDtypeStruct((B, T_pad * D), out_dtype),
        grid_spec=pltpu.PrefetchScalarGridSpec(
            num_scalar_prefetch=0,
            grid=grid,
            in_specs=[
                pl.BlockSpec((TB, D), lambda b, c: (b, 0)),   # x0 batch tile
                pl.BlockSpec((TC, H), lambda b, c: (c, 0)),   # aff rows
                pl.BlockSpec((TC, 1), lambda b, c: (c, 0)),   # dt rows
                _whole((D, H)),                               # w1z
                _whole((H, H)),                               # w15
                _whole((1, H)),                               # b15
                _whole((H, D)),                               # w2
                _whole((1, D)),                               # b2
            ],
            out_specs=pl.BlockSpec((TB, TC * D), lambda b, c: (b, c)),
            scratch_shapes=[pltpu.VMEM((TB, D), jnp.float32)],
        ),
        compiler_params=pltpu.CompilerParams(**cp_kwargs),
        cost_estimate=pl.CostEstimate(
            flops=flops, transcendentals=transcendentals,
            bytes_accessed=bytes_accessed),
    )(x0, aff_p, dt_p, w1z, w15t, b15r, w2t, b2r)

    features = out_flat.reshape(B, T_pad, D)[:, :T, :]     # free reshape
    if augment_dim > 0:
        features = features[:, :, :D - augment_dim]
    return features


def node_reference(trajectories, ti, params, augment_dim=0, extrap=0):
    """Pure-JAX reference mirroring torchdiffeq fixed-grid Euler + OdeFunc."""
    t = jnp.reshape(ti, (-1,))
    x0 = trajectories[:, -1, :] if extrap else trajectories[:, 0, :]
    if augment_dim > 0:
        x0 = jnp.concatenate(
            [x0, jnp.zeros((x0.shape[0], augment_dim), x0.dtype)], axis=1)
    W1, b1, W15, b15, W2, b2 = params

    def f(tt, z):
        tvec = jnp.ones((z.shape[0], 1), z.dtype) * tt
        x = jnp.concatenate([tvec, z], axis=1)
        h = jnp.tanh(x @ W1.T + b1)
        h = jnp.tanh(h @ W15.T + b15)
        return h @ W2.T + b2

    outs = [x0]
    z = x0
    for i in range(1, t.shape[0]):
        z = z + (t[i] - t[i - 1]) * f(t[i - 1], z)
        outs.append(z)
    feats = jnp.stack(outs, axis=0)             # [T, B, D]
    feats = jnp.transpose(feats, (1, 0, 2))     # [B, T, D]
    if augment_dim > 0:
        feats = feats[:, :, :feats.shape[2] - augment_dim]
    return feats


if __name__ == "__main__":
    # Small shapes: batch=8 trajectories of length 6 with obs_dim=4,
    # ODE MLP hidden=32; two time grids (8 points: single-chunk unrolled
    # path; 40 points: multi-chunk carry path).
    B, T_in, obs_dim, H = 8, 6, 4, 32
    augment_dim, extrap = 0, 0

    key = jax.random.PRNGKey(0)
    ks = jax.random.split(key, 8)

    def unif(k, shape, fan_in):
        bound = 1.0 / float(fan_in) ** 0.5   # torch nn.Linear default init
        return jax.random.uniform(k, shape, jnp.float32, -bound, bound)

    d_aug = obs_dim + augment_dim
    W1 = unif(ks[0], (H, d_aug + 1), d_aug + 1)   # fc1 (time_dependent=True)
    b1 = unif(ks[1], (H,), d_aug + 1)
    W15 = unif(ks[2], (H, H), H)                   # fc1_5
    b15 = unif(ks[3], (H,), H)
    W2 = unif(ks[4], (d_aug, H), H)                # fc2
    b2 = unif(ks[5], (d_aug,), H)
    params = (W1, b1, W15, b15, W2, b2)

    trajectories = jax.random.normal(ks[6], (B, T_in, obs_dim), jnp.float32)

    # Case 1: T=8 (single fully-unrolled chunk).
    ti8 = jnp.linspace(0.0, 1.0, 8).astype(jnp.float32)
    out8 = jax.block_until_ready(
        node_forward(trajectories, ti8, params,
                     augment_dim=augment_dim, extrap=extrap))
    ref8 = node_reference(trajectories, ti8, params,
                          augment_dim=augment_dim, extrap=extrap)
    assert out8.shape == (B, 8, obs_dim), out8.shape
    assert jnp.allclose(out8, ref8, atol=1e-5, rtol=1e-5), \
        float(jnp.max(jnp.abs(out8 - ref8)))

    # Case 2: T=40 (multi-chunk carry path across the "arbitrary" grid axis).
    ti40 = jnp.linspace(0.0, 2.0, 40).astype(jnp.float32)
    out40 = jax.block_until_ready(
        node_forward(trajectories, ti40, params,
                     augment_dim=augment_dim, extrap=extrap))
    ref40 = node_reference(trajectories, ti40, params,
                           augment_dim=augment_dim, extrap=extrap)
    assert out40.shape == (B, 40, obs_dim), out40.shape
    assert jnp.allclose(out40, ref40, atol=1e-4, rtol=1e-4), \
        float(jnp.max(jnp.abs(out40 - ref40)))

    print("KERNEL_OK")
</pallas_src>

<mosaic_0001>
module attributes {stable_mosaic.version = 11 : i64} {
  func.func @_node_euler_kernel(%arg0: i32, %arg1: i32, %arg2: memref<8x4xf32, #tpu.memory_space<vmem>>, %arg3: memref<8x32xf32, #tpu.memory_space<vmem>>, %arg4: memref<8x1xf32, #tpu.memory_space<vmem>>, %arg5: memref<4x32xf32, #tpu.memory_space<vmem>>, %arg6: memref<32x32xf32, #tpu.memory_space<vmem>>, %arg7: memref<1x32xf32, #tpu.memory_space<vmem>>, %arg8: memref<32x4xf32, #tpu.memory_space<vmem>>, %arg9: memref<1x4xf32, #tpu.memory_space<vmem>>, %arg10: memref<8x32xf32, #tpu.memory_space<vmem>>, %arg11: memref<8x4xf32, #tpu.memory_space<vmem>>) attributes {dimension_semantics = [#tpu.dimension_semantics<parallel>, #tpu.dimension_semantics<arbitrary>], iteration_bounds = array<i64: 1, 1>, scalar_prefetch = 0 : i64, scratch_operands = 1 : i64, tpu.core_type = #tpu.core_type<tc>, window_params = [{transform_indices = @transform_0, window_bounds = array<i64: 8, 4>}, {transform_indices = @transform_1, window_bounds = array<i64: 8, 32>}, {transform_indices = @transform_2, window_bounds = array<i64: 8, 1>}, {pipeline_mode = #tpu.pipeline_mode<synchronous>, transform_indices = @transform_3, window_bounds = array<i64: 4, 32>}, {pipeline_mode = #tpu.pipeline_mode<synchronous>, transform_indices = @transform_4, window_bounds = array<i64: 32, 32>}, {pipeline_mode = #tpu.pipeline_mode<synchronous>, transform_indices = @transform_5, window_bounds = array<i64: 1, 32>}, {pipeline_mode = #tpu.pipeline_mode<synchronous>, transform_indices = @transform_6, window_bounds = array<i64: 32, 4>}, {pipeline_mode = #tpu.pipeline_mode<synchronous>, transform_indices = @transform_7, window_bounds = array<i64: 1, 4>}, {transform_indices = @transform_8, window_bounds = array<i64: 8, 32>}]} {
    %c0 = arith.constant 0 : index
    %c0_0 = arith.constant 0 : index
    %0 = vector.load %arg5[%c0, %c0_0] : memref<4x32xf32, #tpu.memory_space<vmem>>, vector<4x32xf32>
    %1 = vector.extract_strided_slice %0 {offsets = [0, 0], sizes = [1, 32], strides = [1, 1]} : vector<4x32xf32> to vector<1x32xf32>
    %2 = vector.extract_strided_slice %0 {offsets = [1, 0], sizes = [1, 32], strides = [1, 1]} : vector<4x32xf32> to vector<1x32xf32>
    %3 = vector.extract_strided_slice %0 {offsets = [2, 0], sizes = [1, 32], strides = [1, 1]} : vector<4x32xf32> to vector<1x32xf32>
    %4 = vector.extract_strided_slice %0 {offsets = [3, 0], sizes = [1, 32], strides = [1, 1]} : vector<4x32xf32> to vector<1x32xf32>
    %c0_1 = arith.constant 0 : index
    %c0_2 = arith.constant 0 : index
    %5 = vector.load %arg6[%c0_1, %c0_2] : memref<32x32xf32, #tpu.memory_space<vmem>>, vector<32x32xf32>
    %c0_3 = arith.constant 0 : index
    %c0_4 = arith.constant 0 : index
    %6 = vector.load %arg7[%c0_3, %c0_4] : memref<1x32xf32, #tpu.memory_space<vmem>>, vector<1x32xf32>
    %c0_5 = arith.constant 0 : index
    %c0_6 = arith.constant 0 : index
    %7 = vector.load %arg8[%c0_5, %c0_6] : memref<32x4xf32, #tpu.memory_space<vmem>>, vector<32x4xf32>
    %c0_7 = arith.constant 0 : index
    %c0_8 = arith.constant 0 : index
    %8 = vector.load %arg9[%c0_7, %c0_8] : memref<1x4xf32, #tpu.memory_space<vmem>>, vector<1x4xf32>
    %c0_9 = arith.constant 0 : index
    %c0_10 = arith.constant 0 : index
    %9 = vector.load %arg2[%c0_9, %c0_10] : memref<8x4xf32, #tpu.memory_space<vmem>>, vector<8x4xf32>
    %c0_11 = arith.constant 0 : index
    %c0_12 = arith.constant 0 : index
    %10 = vector.load %arg10[%c0_11, %c0_12] : memref<8x32xf32, #tpu.memory_space<vmem>>, vector<8x4xf32>
    tpu.vector_store %arg10[%c0_11, %c0_12], %9 {strides = array<i32>} : memref<8x32xf32, #tpu.memory_space<vmem>>, vector<8x4xf32>,
    %c1 = arith.constant 1 : index
    %c0_13 = arith.constant 0 : index
    %11 = vector.load %arg3[%c1, %c0_13] : memref<8x32xf32, #tpu.memory_space<vmem>>, vector<1x32xf32>
    %c1_14 = arith.constant 1 : index
    %c0_15 = arith.constant 0 : index
    %12 = vector.load %arg4[%c1_14, %c0_15] : memref<8x1xf32, #tpu.memory_space<vmem>>, vector<1x1xf32>
    %13 = vector.extract_strided_slice %9 {offsets = [0, 0], sizes = [8, 1], strides = [1, 1]} : vector<8x4xf32> to vector<8x1xf32>
    %14 = vector.broadcast %13 : vector<8x1xf32> to vector<8x32xf32>
    %15 = vector.broadcast %1 : vector<1x32xf32> to vector<8x32xf32>
    %16 = arith.mulf %14, %15 : vector<8x32xf32>
    %17 = vector.broadcast %11 : vector<1x32xf32> to vector<8x32xf32>
    %18 = arith.addf %17, %16 : vector<8x32xf32>
    %19 = vector.extract_strided_slice %9 {offsets = [0, 1], sizes = [8, 1], strides = [1, 1]} : vector<8x4xf32> to vector<8x1xf32>
    %20 = vector.broadcast %19 : vector<8x1xf32> to vector<8x32xf32>
    %21 = vector.broadcast %2 : vector<1x32xf32> to vector<8x32xf32>
    %22 = arith.mulf %20, %21 : vector<8x32xf32>
    %23 = arith.addf %18, %22 : vector<8x32xf32>
    %24 = vector.extract_strided_slice %9 {offsets = [0, 2], sizes = [8, 1], strides = [1, 1]} : vector<8x4xf32> to vector<8x1xf32>
    %25 = vector.broadcast %24 : vector<8x1xf32> to vector<8x32xf32>
    %26 = vector.broadcast %3 : vector<1x32xf32> to vector<8x32xf32>
    %27 = arith.mulf %25, %26 : vector<8x32xf32>
    %28 = arith.addf %23, %27 : vector<8x32xf32>
    %29 = vector.extract_strided_slice %9 {offsets = [0, 3], sizes = [8, 1], strides = [1, 1]} : vector<8x4xf32> to vector<8x1xf32>
    %30 = vector.broadcast %29 : vector<8x1xf32> to vector<8x32xf32>
    %31 = vector.broadcast %4 : vector<1x32xf32> to vector<8x32xf32>
    %32 = arith.mulf %30, %31 : vector<8x32xf32>
    %33 = arith.addf %28, %32 : vector<8x32xf32>
    %34 = math.tanh %33 : vector<8x32xf32>
    %cst = arith.constant dense<0.000000e+00> : vector<8x32xf32>
    %35 = tpu.matmul %34, %5, %cst {dimension_numbers = #tpu.dot_dimension_numbers<[1], [0], [0], [1], [0, 0, 1, 1], [], []>} : vector<8x32xf32>, vector<32x32xf32>, vector<8x32xf32> -> vector<8x32xf32>
    %36 = vector.broadcast %6 : vector<1x32xf32> to vector<8x32xf32>
    %37 = arith.addf %35, %36 : vector<8x32xf32>
    %38 = math.tanh %37 : vector<8x32xf32>
    %cst_16 = arith.constant dense<0.000000e+00> : vector<8x4xf32>
    %39 = tpu.matmul %38, %7, %cst_16 {dimension_numbers = #tpu.dot_dimension_numbers<[1], [0], [0], [1], [0, 0, 1, 1], [], []>} : vector<8x32xf32>, vector<32x4xf32>, vector<8x4xf32> -> vector<8x4xf32>
    %40 = vector.broadcast %8 : vector<1x4xf32> to vector<8x4xf32>
    %41 = arith.addf %39, %40 : vector<8x4xf32>
    %42 = vector.broadcast %12 : vector<1x1xf32> to vector<8x4xf32>
    %43 = arith.mulf %42, %41 : vector<8x4xf32>
    %44 = arith.addf %9, %43 : vector<8x4xf32>
    %c0_17 = arith.constant 0 : index
    %c4 = arith.constant 4 : index
    %45 = vector.load %arg10[%c0_17, %c4] : memref<8x32xf32, #tpu.memory_space<vmem>>, vector<8x4xf32>
    tpu.vector_store %arg10[%c0_17, %c4], %44 {strides = array<i32>} : memref<8x32xf32, #tpu.memory_space<vmem>>, vector<8x4xf32>,
    %c2 = arith.constant 2 : index
    %c0_18 = arith.constant 0 : index
    %46 = vector.load %arg3[%c2, %c0_18] : memref<8x32xf32, #tpu.memory_space<vmem>>, vector<1x32xf32>
    %c2_19 = arith.constant 2 : index
    %c0_20 = arith.constant 0 : index
    %47 = vector.load %arg4[%c2_19, %c0_20] : memref<8x1xf32, #tpu.memory_space<vmem>>, vector<1x1xf32>
    %48 = vector.extract_strided_slice %44 {offsets = [0, 0], sizes = [8, 1], strides = [1, 1]} : vector<8x4xf32> to vector<8x1xf32>
    %49 = vector.broadcast %48 : vector<8x1xf32> to vector<8x32xf32>
    %50 = vector.broadcast %1 : vector<1x32xf32> to vector<8x32xf32>
    %51 = arith.mulf %49, %50 : vector<8x32xf32>
    %52 = vector.broadcast %46 : vector<1x32xf32> to vector<8x32xf32>
    %53 = arith.addf %52, %51 : vector<8x32xf32>
    %54 = vector.extract_strided_slice %44 {offsets = [0, 1], sizes = [8, 1], strides = [1, 1]} : vector<8x4xf32> to vector<8x1xf32>
    %55 = vector.broadcast %54 : vector<8x1xf32> to vector<8x32xf32>
    %56 = vector.broadcast %2 : vector<1x32xf32> to vector<8x32xf32>
    %57 = arith.mulf %55, %56 : vector<8x32xf32>
    %58 = arith.addf %53, %57 : vector<8x32xf32>
    %59 = vector.extract_strided_slice %44 {offsets = [0, 2], sizes = [8, 1], strides = [1, 1]} : vector<8x4xf32> to vector<8x1xf32>
    %60 = vector.broadcast %59 : vector<8x1xf32> to vector<8x32xf32>
    %61 = vector.broadcast %3 : vector<1x32xf32> to vector<8x32xf32>
    %62 = arith.mulf %60, %61 : vector<8x32xf32>
    %63 = arith.addf %58, %62 : vector<8x32xf32>
    %64 = vector.extract_strided_slice %44 {offsets = [0, 3], sizes = [8, 1], strides = [1, 1]} : vector<8x4xf32> to vector<8x1xf32>
    %65 = vector.broadcast %64 : vector<8x1xf32> to vector<8x32xf32>
    %66 = vector.broadcast %4 : vector<1x32xf32> to vector<8x32xf32>
    %67 = arith.mulf %65, %66 : vector<8x32xf32>
    %68 = arith.addf %63, %67 : vector<8x32xf32>
    %69 = math.tanh %68 : vector<8x32xf32>
    %cst_21 = arith.constant dense<0.000000e+00> : vector<8x32xf32>
    %70 = tpu.matmul %69, %5, %cst_21 {dimension_numbers = #tpu.dot_dimension_numbers<[1], [0], [0], [1], [0, 0, 1, 1], [], []>} : vector<8x32xf32>, vector<32x32xf32>, vector<8x32xf32> -> vector<8x32xf32>
    %71 = vector.broadcast %6 : vector<1x32xf32> to vector<8x32xf32>
    %72 = arith.addf %70, %71 : vector<8x32xf32>
    %73 = math.tanh %72 : vector<8x32xf32>
    %cst_22 = arith.constant dense<0.000000e+00> : vector<8x4xf32>
    %74 = tpu.matmul %73, %7, %cst_22 {dimension_numbers = #tpu.dot_dimension_numbers<[1], [0], [0], [1], [0, 0, 1, 1], [], []>} : vector<8x32xf32>, vector<32x4xf32>, vector<8x4xf32> -> vector<8x4xf32>
    %75 = vector.broadcast %8 : vector<1x4xf32> to vector<8x4xf32>
    %76 = arith.addf %74, %75 : vector<8x4xf32>
    %77 = vector.broadcast %47 : vector<1x1xf32> to vector<8x4xf32>
    %78 = arith.mulf %77, %76 : vector<8x4xf32>
    %79 = arith.addf %44, %78 : vector<8x4xf32>
    %c0_23 = arith.constant 0 : index
    %c8 = arith.constant 8 : index
    %80 = vector.load %arg10[%c0_23, %c8] : memref<8x32xf32, #tpu.memory_space<vmem>>, vector<8x4xf32>
    tpu.vector_store %arg10[%c0_23, %c8], %79 {strides = array<i32>} : memref<8x32xf32, #tpu.memory_space<vmem>>, vector<8x4xf32>,
    %c3 = arith.constant 3 : index
    %c0_24 = arith.constant 0 : index
    %81 = vector.load %arg3[%c3, %c0_24] : memref<8x32xf32, #tpu.memory_space<vmem>>, vector<1x32xf32>
    %c3_25 = arith.constant 3 : index
    %c0_26 = arith.constant 0 : index
    %82 = vector.load %arg4[%c3_25, %c0_26] : memref<8x1xf32, #tpu.memory_space<vmem>>, vector<1x1xf32>
    %83 = vector.extract_strided_slice %79 {offsets = [0, 0], sizes = [8, 1], strides = [1, 1]} : vector<8x4xf32> to vector<8x1xf32>
    %84 = vector.broadcast %83 : vector<8x1xf32> to vector<8x32xf32>
    %85 = vector.broadcast %1 : vector<1x32xf32> to vector<8x32xf32>
    %86 = arith.mulf %84, %85 : vector<8x32xf32>
    %87 = vector.broadcast %81 : vector<1x32xf32> to vector<8x32xf32>
    %88 = arith.addf %87, %86 : vector<8x32xf32>
    %89 = vector.extract_strided_slice %79 {offsets = [0, 1], sizes = [8, 1], strides = [1, 1]} : vector<8x4xf32> to vector<8x1xf32>
    %90 = vector.broadcast %89 : vector<8x1xf32> to vector<8x32xf32>
    %91 = vector.broadcast %2 : vector<1x32xf32> to vector<8x32xf32>
    %92 = arith.mulf %90, %91 : vector<8x32xf32>
    %93 = arith.addf %88, %92 : vector<8x32xf32>
    %94 = vector.extract_strided_slice %79 {offsets = [0, 2], sizes = [8, 1], strides = [1, 1]} : vector<8x4xf32> to vector<8x1xf32>
    %95 = vector.broadcast %94 : vector<8x1xf32> to vector<8x32xf32>
    %96 = vector.broadcast %3 : vector<1x32xf32> to vector<8x32xf32>
    %97 = arith.mulf %95, %96 : vector<8x32xf32>
    %98 = arith.addf %93, %97 : vector<8x32xf32>
    %99 = vector.extract_strided_slice %79 {offsets = [0, 3], sizes = [8, 1], strides = [1, 1]} : vector<8x4xf32> to vector<8x1xf32>
    %100 = vector.broadcast %99 : vector<8x1xf32> to vector<8x32xf32>
    %101 = vector.broadcast %4 : vector<1x32xf32> to vector<8x32xf32>
    %102 = arith.mulf %100, %101 : vector<8x32xf32>
    %103 = arith.addf %98, %102 : vector<8x32xf32>
    %104 = math.tanh %103 : vector<8x32xf32>
    %cst_27 = arith.constant dense<0.000000e+00> : vector<8x32xf32>
    %105 = tpu.matmul %104, %5, %cst_27 {dimension_numbers = #tpu.dot_dimension_numbers<[1], [0], [0], [1], [0, 0, 1, 1], [], []>} : vector<8x32xf32>, vector<32x32xf32>, vector<8x32xf32> -> vector<8x32xf32>
    %106 = vector.broadcast %6 : vector<1x32xf32> to vector<8x32xf32>
    %107 = arith.addf %105, %106 : vector<8x32xf32>
    %108 = math.tanh %107 : vector<8x32xf32>
    %cst_28 = arith.constant dense<0.000000e+00> : vector<8x4xf32>
    %109 = tpu.matmul %108, %7, %cst_28 {dimension_numbers = #tpu.dot_dimension_numbers<[1], [0], [0], [1], [0, 0, 1, 1], [], []>} : vector<8x32xf32>, vector<32x4xf32>, vector<8x4xf32> -> vector<8x4xf32>
    %110 = vector.broadcast %8 : vector<1x4xf32> to vector<8x4xf32>
    %111 = arith.addf %109, %110 : vector<8x4xf32>
    %112 = vector.broadcast %82 : vector<1x1xf32> to vector<8x4xf32>
    %113 = arith.mulf %112, %111 : vector<8x4xf32>
    %114 = arith.addf %79, %113 : vector<8x4xf32>
    %c0_29 = arith.constant 0 : index
    %c12 = arith.constant 12 : index
    %115 = vector.load %arg10[%c0_29, %c12] : memref<8x32xf32, #tpu.memory_space<vmem>>, vector<8x4xf32>
    tpu.vector_store %arg10[%c0_29, %c12], %114 {strides = array<i32>} : memref<8x32xf32, #tpu.memory_space<vmem>>, vector<8x4xf32>,
    %c4_30 = arith.constant 4 : index
    %c0_31 = arith.constant 0 : index
    %116 = vector.load %arg3[%c4_30, %c0_31] : memref<8x32xf32, #tpu.memory_space<vmem>>, vector<1x32xf32>
    %c4_32 = arith.constant 4 : index
    %c0_33 = arith.constant 0 : index
    %117 = vector.load %arg4[%c4_32, %c0_33] : memref<8x1xf32, #tpu.memory_space<vmem>>, vector<1x1xf32>
    %118 = vector.extract_strided_slice %114 {offsets = [0, 0], sizes = [8, 1], strides = [1, 1]} : vector<8x4xf32> to vector<8x1xf32>
    %119 = vector.broadcast %118 : vector<8x1xf32> to vector<8x32xf32>
    %120 = vector.broadcast %1 : vector<1x32xf32> to vector<8x32xf32>
    %121 = arith.mulf %119, %120 : vector<8x32xf32>
    %122 = vector.broadcast %116 : vector<1x32xf32> to vector<8x32xf32>
    %123 = arith.addf %122, %121 : vector<8x32xf32>
    %124 = vector.extract_strided_slice %114 {offsets = [0, 1], sizes = [8, 1], strides = [1, 1]} : vector<8x4xf32> to vector<8x1xf32>
    %125 = vector.broadcast %124 : vector<8x1xf32> to vector<8x32xf32>
    %126 = vector.broadcast %2 : vector<1x32xf32> to vector<8x32xf32>
    %127 = arith.mulf %125, %126 : vector<8x32xf32>
    %128 = arith.addf %123, %127 : vector<8x32xf32>
    %129 = vector.extract_strided_slice %114 {offsets = [0, 2], sizes = [8, 1], strides = [1, 1]} : vector<8x4xf32> to vector<8x1xf32>
    %130 = vector.broadcast %129 : vector<8x1xf32> to vector<8x32xf32>
    %131 = vector.broadcast %3 : vector<1x32xf32> to vector<8x32xf32>
    %132 = arith.mulf %130, %131 : vector<8x32xf32>
    %133 = arith.addf %128, %132 : vector<8x32xf32>
    %134 = vector.extract_strided_slice %114 {offsets = [0, 3], sizes = [8, 1], strides = [1, 1]} : vector<8x4xf32> to vector<8x1xf32>
    %135 = vector.broadcast %134 : vector<8x1xf32> to vector<8x32xf32>
    %136 = vector.broadcast %4 : vector<1x32xf32> to vector<8x32xf32>
    %137 = arith.mulf %135, %136 : vector<8x32xf32>
    %138 = arith.addf %133, %137 : vector<8x32xf32>
    %139 = math.tanh %138 : vector<8x32xf32>
    %cst_34 = arith.constant dense<0.000000e+00> : vector<8x32xf32>
    %140 = tpu.matmul %139, %5, %cst_34 {dimension_numbers = #tpu.dot_dimension_numbers<[1], [0], [0], [1], [0, 0, 1, 1], [], []>} : vector<8x32xf32>, vector<32x32xf32>, vector<8x32xf32> -> vector<8x32xf32>
    %141 = vector.broadcast %6 : vector<1x32xf32> to vector<8x32xf32>
    %142 = arith.addf %140, %141 : vector<8x32xf32>
    %143 = math.tanh %142 : vector<8x32xf32>
    %cst_35 = arith.constant dense<0.000000e+00> : vector<8x4xf32>
    %144 = tpu.matmul %143, %7, %cst_35 {dimension_numbers = #tpu.dot_dimension_numbers<[1], [0], [0], [1], [0, 0, 1, 1], [], []>} : vector<8x32xf32>, vector<32x4xf32>, vector<8x4xf32> -> vector<8x4xf32>
    %145 = vector.broadcast %8 : vector<1x4xf32> to vector<8x4xf32>
    %146 = arith.addf %144, %145 : vector<8x4xf32>
    %147 = vector.broadcast %117 : vector<1x1xf32> to vector<8x4xf32>
    %148 = arith.mulf %147, %146 : vector<8x4xf32>
    %149 = arith.addf %114, %148 : vector<8x4xf32>
    %c0_36 = arith.constant 0 : index
    %c16 = arith.constant 16 : index
    %150 = vector.load %arg10[%c0_36, %c16] : memref<8x32xf32, #tpu.memory_space<vmem>>, vector<8x4xf32>
    tpu.vector_store %arg10[%c0_36, %c16], %149 {strides = array<i32>} : memref<8x32xf32, #tpu.memory_space<vmem>>, vector<8x4xf32>,
    %c5 = arith.constant 5 : index
    %c0_37 = arith.constant 0 : index
    %151 = vector.load %arg3[%c5, %c0_37] : memref<8x32xf32, #tpu.memory_space<vmem>>, vector<1x32xf32>
    %c5_38 = arith.constant 5 : index
    %c0_39 = arith.constant 0 : index
    %152 = vector.load %arg4[%c5_38, %c0_39] : memref<8x1xf32, #tpu.memory_space<vmem>>, vector<1x1xf32>
    %153 = vector.extract_strided_slice %149 {offsets = [0, 0], sizes = [8, 1], strides = [1, 1]} : vector<8x4xf32> to vector<8x1xf32>
    %154 = vector.broadcast %153 : vector<8x1xf32> to vector<8x32xf32>
    %155 = vector.broadcast %1 : vector<1x32xf32> to vector<8x32xf32>
    %156 = arith.mulf %154, %155 : vector<8x32xf32>
    %157 = vector.broadcast %151 : vector<1x32xf32> to vector<8x32xf32>
    %158 = arith.addf %157, %156 : vector<8x32xf32>
    %159 = vector.extract_strided_slice %149 {offsets = [0, 1], sizes = [8, 1], strides = [1, 1]} : vector<8x4xf32> to vector<8x1xf32>
    %160 = vector.broadcast %159 : vector<8x1xf32> to vector<8x32xf32>
    %161 = vector.broadcast %2 : vector<1x32xf32> to vector<8x32xf32>
    %162 = arith.mulf %160, %161 : vector<8x32xf32>
    %163 = arith.addf %158, %162 : vector<8x32xf32>
    %164 = vector.extract_strided_slice %149 {offsets = [0, 2], sizes = [8, 1], strides = [1, 1]} : vector<8x4xf32> to vector<8x1xf32>
    %165 = vector.broadcast %164 : vector<8x1xf32> to vector<8x32xf32>
    %166 = vector.broadcast %3 : vector<1x32xf32> to vector<8x32xf32>
    %167 = arith.mulf %165, %166 : vector<8x32xf32>
    %168 = arith.addf %163, %167 : vector<8x32xf32>
    %169 = vector.extract_strided_slice %149 {offsets = [0, 3], sizes = [8, 1], strides = [1, 1]} : vector<8x4xf32> to vector<8x1xf32>
    %170 = vector.broadcast %169 : vector<8x1xf32> to vector<8x32xf32>
    %171 = vector.broadcast %4 : vector<1x32xf32> to vector<8x32xf32>
    %172 = arith.mulf %170, %171 : vector<8x32xf32>
    %173 = arith.addf %168, %172 : vector<8x32xf32>
    %174 = math.tanh %173 : vector<8x32xf32>
    %cst_40 = arith.constant dense<0.000000e+00> : vector<8x32xf32>
    %175 = tpu.matmul %174, %5, %cst_40 {dimension_numbers = #tpu.dot_dimension_numbers<[1], [0], [0], [1], [0, 0, 1, 1], [], []>} : vector<8x32xf32>, vector<32x32xf32>, vector<8x32xf32> -> vector<8x32xf32>
    %176 = vector.broadcast %6 : vector<1x32xf32> to vector<8x32xf32>
    %177 = arith.addf %175, %176 : vector<8x32xf32>
    %178 = math.tanh %177 : vector<8x32xf32>
    %cst_41 = arith.constant dense<0.000000e+00> : vector<8x4xf32>
    %179 = tpu.matmul %178, %7, %cst_41 {dimension_numbers = #tpu.dot_dimension_numbers<[1], [0], [0], [1], [0, 0, 1, 1], [], []>} : vector<8x32xf32>, vector<32x4xf32>, vector<8x4xf32> -> vector<8x4xf32>
    %180 = vector.broadcast %8 : vector<1x4xf32> to vector<8x4xf32>
    %181 = arith.addf %179, %180 : vector<8x4xf32>
    %182 = vector.broadcast %152 : vector<1x1xf32> to vector<8x4xf32>
    %183 = arith.mulf %182, %181 : vector<8x4xf32>
    %184 = arith.addf %149, %183 : vector<8x4xf32>
    %c0_42 = arith.constant 0 : index
    %c20 = arith.constant 20 : index
    %185 = vector.load %arg10[%c0_42, %c20] : memref<8x32xf32, #tpu.memory_space<vmem>>, vector<8x4xf32>
    tpu.vector_store %arg10[%c0_42, %c20], %184 {strides = array<i32>} : memref<8x32xf32, #tpu.memory_space<vmem>>, vector<8x4xf32>,
    %c6 = arith.constant 6 : index
    %c0_43 = arith.constant 0 : index
    %186 = vector.load %arg3[%c6, %c0_43] : memref<8x32xf32, #tpu.memory_space<vmem>>, vector<1x32xf32>
    %c6_44 = arith.constant 6 : index
    %c0_45 = arith.constant 0 : index
    %187 = vector.load %arg4[%c6_44, %c0_45] : memref<8x1xf32, #tpu.memory_space<vmem>>, vector<1x1xf32>
    %188 = vector.extract_strided_slice %184 {offsets = [0, 0], sizes = [8, 1], strides = [1, 1]} : vector<8x4xf32> to vector<8x1xf32>
    %189 = vector.broadcast %188 : vector<8x1xf32> to vector<8x32xf32>
    %190 = vector.broadcast %1 : vector<1x32xf32> to vector<8x32xf32>
    %191 = arith.mulf %189, %190 : vector<8x32xf32>
    %192 = vector.broadcast %186 : vector<1x32xf32> to vector<8x32xf32>
    %193 = arith.addf %192, %191 : vector<8x32xf32>
    %194 = vector.extract_strided_slice %184 {offsets = [0, 1], sizes = [8, 1], strides = [1, 1]} : vector<8x4xf32> to vector<8x1xf32>
    %195 = vector.broadcast %194 : vector<8x1xf32> to vector<8x32xf32>
    %196 = vector.broadcast %2 : vector<1x32xf32> to vector<8x32xf32>
    %197 = arith.mulf %195, %196 : vector<8x32xf32>
    %198 = arith.addf %193, %197 : vector<8x32xf32>
    %199 = vector.extract_strided_slice %184 {offsets = [0, 2], sizes = [8, 1], strides = [1, 1]} : vector<8x4xf32> to vector<8x1xf32>
    %200 = vector.broadcast %199 : vector<8x1xf32> to vector<8x32xf32>
    %201 = vector.broadcast %3 : vector<1x32xf32> to vector<8x32xf32>
    %202 = arith.mulf %200, %201 : vector<8x32xf32>
    %203 = arith.addf %198, %202 : vector<8x32xf32>
    %204 = vector.extract_strided_slice %184 {offsets = [0, 3], sizes = [8, 1], strides = [1, 1]} : vector<8x4xf32> to vector<8x1xf32>
    %205 = vector.broadcast %204 : vector<8x1xf32> to vector<8x32xf32>
    %206 = vector.broadcast %4 : vector<1x32xf32> to vector<8x32xf32>
    %207 = arith.mulf %205, %206 : vector<8x32xf32>
    %208 = arith.addf %203, %207 : vector<8x32xf32>
    %209 = math.tanh %208 : vector<8x32xf32>
    %cst_46 = arith.constant dense<0.000000e+00> : vector<8x32xf32>
    %210 = tpu.matmul %209, %5, %cst_46 {dimension_numbers = #tpu.dot_dimension_numbers<[1], [0], [0], [1], [0, 0, 1, 1], [], []>} : vector<8x32xf32>, vector<32x32xf32>, vector<8x32xf32> -> vector<8x32xf32>
    %211 = vector.broadcast %6 : vector<1x32xf32> to vector<8x32xf32>
    %212 = arith.addf %210, %211 : vector<8x32xf32>
    %213 = math.tanh %212 : vector<8x32xf32>
    %cst_47 = arith.constant dense<0.000000e+00> : vector<8x4xf32>
    %214 = tpu.matmul %213, %7, %cst_47 {dimension_numbers = #tpu.dot_dimension_numbers<[1], [0], [0], [1], [0, 0, 1, 1], [], []>} : vector<8x32xf32>, vector<32x4xf32>, vector<8x4xf32> -> vector<8x4xf32>
    %215 = vector.broadcast %8 : vector<1x4xf32> to vector<8x4xf32>
    %216 = arith.addf %214, %215 : vector<8x4xf32>
    %217 = vector.broadcast %187 : vector<1x1xf32> to vector<8x4xf32>
    %218 = arith.mulf %217, %216 : vector<8x4xf32>
    %219 = arith.addf %184, %218 : vector<8x4xf32>
    %c0_48 = arith.constant 0 : index
    %c24 = arith.constant 24 : index
    %220 = vector.load %arg10[%c0_48, %c24] : memref<8x32xf32, #tpu.memory_space<vmem>>, vector<8x4xf32>
    tpu.vector_store %arg10[%c0_48, %c24], %219 {strides = array<i32>} : memref<8x32xf32, #tpu.memory_space<vmem>>, vector<8x4xf32>,
    %c7 = arith.constant 7 : index
    %c0_49 = arith.constant 0 : index
    %221 = vector.load %arg3[%c7, %c0_49] : memref<8x32xf32, #tpu.memory_space<vmem>>, vector<1x32xf32>
    %c7_50 = arith.constant 7 : index
    %c0_51 = arith.constant 0 : index
    %222 = vector.load %arg4[%c7_50, %c0_51] : memref<8x1xf32, #tpu.memory_space<vmem>>, vector<1x1xf32>
    %223 = vector.extract_strided_slice %219 {offsets = [0, 0], sizes = [8, 1], strides = [1, 1]} : vector<8x4xf32> to vector<8x1xf32>
    %224 = vector.broadcast %223 : vector<8x1xf32> to vector<8x32xf32>
    %225 = vector.broadcast %1 : vector<1x32xf32> to vector<8x32xf32>
    %226 = arith.mulf %224, %225 : vector<8x32xf32>
    %227 = vector.broadcast %221 : vector<1x32xf32> to vector<8x32xf32>
    %228 = arith.addf %227, %226 : vector<8x32xf32>
    %229 = vector.extract_strided_slice %219 {offsets = [0, 1], sizes = [8, 1], strides = [1, 1]} : vector<8x4xf32> to vector<8x1xf32>
    %230 = vector.broadcast %229 : vector<8x1xf32> to vector<8x32xf32>
    %231 = vector.broadcast %2 : vector<1x32xf32> to vector<8x32xf32>
    %232 = arith.mulf %230, %231 : vector<8x32xf32>
    %233 = arith.addf %228, %232 : vector<8x32xf32>
    %234 = vector.extract_strided_slice %219 {offsets = [0, 2], sizes = [8, 1], strides = [1, 1]} : vector<8x4xf32> to vector<8x1xf32>
    %235 = vector.broadcast %234 : vector<8x1xf32> to vector<8x32xf32>
    %236 = vector.broadcast %3 : vector<1x32xf32> to vector<8x32xf32>
    %237 = arith.mulf %235, %236 : vector<8x32xf32>
    %238 = arith.addf %233, %237 : vector<8x32xf32>
    %239 = vector.extract_strided_slice %219 {offsets = [0, 3], sizes = [8, 1], strides = [1, 1]} : vector<8x4xf32> to vector<8x1xf32>
    %240 = vector.broadcast %239 : vector<8x1xf32> to vector<8x32xf32>
    %241 = vector.broadcast %4 : vector<1x32xf32> to vector<8x32xf32>
    %242 = arith.mulf %240, %241 : vector<8x32xf32>
    %243 = arith.addf %238, %242 : vector<8x32xf32>
    %244 = math.tanh %243 : vector<8x32xf32>
    %cst_52 = arith.constant dense<0.000000e+00> : vector<8x32xf32>
    %245 = tpu.matmul %244, %5, %cst_52 {dimension_numbers = #tpu.dot_dimension_numbers<[1], [0], [0], [1], [0, 0, 1, 1], [], []>} : vector<8x32xf32>, vector<32x32xf32>, vector<8x32xf32> -> vector<8x32xf32>
    %246 = vector.broadcast %6 : vector<1x32xf32> to vector<8x32xf32>
    %247 = arith.addf %245, %246 : vector<8x32xf32>
    %248 = math.tanh %247 : vector<8x32xf32>
    %cst_53 = arith.constant dense<0.000000e+00> : vector<8x4xf32>
    %249 = tpu.matmul %248, %7, %cst_53 {dimension_numbers = #tpu.dot_dimension_numbers<[1], [0], [0], [1], [0, 0, 1, 1], [], []>} : vector<8x32xf32>, vector<32x4xf32>, vector<8x4xf32> -> vector<8x4xf32>
    %250 = vector.broadcast %8 : vector<1x4xf32> to vector<8x4xf32>
    %251 = arith.addf %249, %250 : vector<8x4xf32>
    %252 = vector.broadcast %222 : vector<1x1xf32> to vector<8x4xf32>
    %253 = arith.mulf %252, %251 : vector<8x4xf32>
    %254 = arith.addf %219, %253 : vector<8x4xf32>
    %c0_54 = arith.constant 0 : index
    %c28 = arith.constant 28 : index
    %255 = vector.load %arg10[%c0_54, %c28] : memref<8x32xf32, #tpu.memory_space<vmem>>, vector<8x4xf32>
    tpu.vector_store %arg10[%c0_54, %c28], %254 {strides = array<i32>} : memref<8x32xf32, #tpu.memory_space<vmem>>, vector<8x4xf32>,
    return
  }
  func.func @transform_0(%arg0: i32, %arg1: i32) -> (i32, i32) {
    %c0_i32 = arith.constant 0 : i32
    %c0_i32_0 = arith.constant 0 : i32
    return %arg0, %c0_i32 : i32, i32
  }
  func.func @transform_1(%arg0: i32, %arg1: i32) -> (i32, i32) {
    %c0_i32 = arith.constant 0 : i32
    %c0_i32_0 = arith.constant 0 : i32
    return %arg1, %c0_i32 : i32, i32
  }
  func.func @transform_2(%arg0: i32, %arg1: i32) -> (i32, i32) {
    %c0_i32 = arith.constant 0 : i32
    %c0_i32_0 = arith.constant 0 : i32
    return %arg1, %c0_i32 : i32, i32
  }
  func.func @transform_3(%arg0: i32, %arg1: i32) -> (i32, i32) {
    %c0_i32 = arith.constant 0 : i32
    %c0_i32_0 = arith.constant 0 : i32
    %c0_i32_1 = arith.constant 0 : i32
    return %c0_i32, %c0_i32_0 : i32, i32
  }
  func.func @transform_4(%arg0: i32, %arg1: i32) -> (i32, i32) {
    %c0_i32 = arith.constant 0 : i32
    %c0_i32_0 = arith.constant 0 : i32
    %c0_i32_1 = arith.constant 0 : i32
    return %c0_i32, %c0_i32_0 : i32, i32
  }
  func.func @transform_5(%arg0: i32, %arg1: i32) -> (i32, i32) {
    %c0_i32 = arith.constant 0 : i32
    %c0_i32_0 = arith.constant 0 : i32
    %c0_i32_1 = arith.constant 0 : i32
    return %c0_i32, %c0_i32_0 : i32, i32
  }
  func.func @transform_6(%arg0: i32, %arg1: i32) -> (i32, i32) {
    %c0_i32 = arith.constant 0 : i32
    %c0_i32_0 = arith.constant 0 : i32
    %c0_i32_1 = arith.constant 0 : i32
    return %c0_i32, %c0_i32_0 : i32, i32
  }
  func.func @transform_7(%arg0: i32, %arg1: i32) -> (i32, i32) {
    %c0_i32 = arith.constant 0 : i32
    %c0_i32_0 = arith.constant 0 : i32
    %c0_i32_1 = arith.constant 0 : i32
    return %c0_i32, %c0_i32_0 : i32, i32
  }
  func.func @transform_8(%arg0: i32, %arg1: i32) -> (i32, i32) {
    %c0_i32 = arith.constant 0 : i32
    return %arg0, %arg1 : i32, i32
  }
}

</mosaic_0001>

<bundles_post_ra>
// kernel: tpu_custom_call.1
= control target key start
LH: loop header
LB: loop body
LE: loop exit
PB: predicated region body
PF: predicated region fallthrough
CT: control target
= control target key end

     0   :  { %v1771_v1 = vmov 0   ;;  %v1772_v2 = vmov 2   ;;  %s2219_s0 = inlined_call_operand.vmem [shape: f32[8,4], index: 0, kind: input, shape index: {}]   ;;  %s2220_s1 = inlined_call_operand.vmem [shape: f32[8,32], index: 1, kind: input, shape index: {}]   ;;  %s2221_s2 = inlined_call_operand.vmem [shape: f32[8,1], index: 2, kind: input, shape index: {}]   ;;  %s2222_s3 = inlined_call_operand.vmem [shape: f32[4,32], index: 3, kind: input, shape index: {}]   ;;  %s2223_s4 = inlined_call_operand.vmem [shape: f32[32,32], index: 4, kind: input, shape index: {}]   ;;  %s2224_s5 = inlined_call_operand.vmem [shape: f32[1,32], index: 5, kind: input, shape index: {}]   ;;  %s2225_s6 = inlined_call_operand.vmem [shape: f32[32,4], index: 6, kind: input, shape index: {}]   ;;  %s2226_s7 = inlined_call_operand.vmem [shape: f32[1,4], index: 7, kind: input, shape index: {}]   ;;  %s2227_s8 = inlined_call_operand.hbm [shape: f32[8,32], index: 8, kind: output, shape index: {}]  }
   0x1   :  { %v1833_v0 = vld [vmem:[%s2219_s0] sm:$0xff]  ;;  %1693 = vset.pattern.permute.xlu0 %v1771_v1  ;;  %1695 = vset.pattern.permute.xlu1 %v1772_v2 }
   0x2   :  { %13 = vsyncpa [#allocation4], 0  ;;  %48 = vperm.xlu0 %1693, %v1833_v0   ;;  %72 = vperm.xlu1 %1695, %v1833_v0   ;;  %v1773_v3 = vmov 1   ;;  %v1774_v4 = vmov 3   ;;  %v1846_v5 = vld [vmem:[%s2223_s4 + $0x18] sm:$0xff]  ;;  %v1775_v6 = vmov 0.0   ;;  %v51_v10 = vlaneseq }
   0x3   :  { %1511 = vmatprep.subr.mxu0 %v1775_v6  ;;  %v1853_v7 = vld [vmem:[%s2223_s4 + $0x10] sm:$0xff]  ;;  %vm1776_vm0 = vmmov 0   ;;  %1522 = vmatprep.subr.mxu1 %v1775_v6  ;;  %v1863_v8 = vld [vmem:[%s2223_s4 + $0x8] sm:$0xff]  ;;  %v1872_v9 = vld [vmem:[%s2223_s4] sm:$0xff]  ;;  %vm98_vm1 = vcmask 261120   ;;  %vm42_vm2 = vcmask 31744  }
   0x4   :  { %1519 = vmatprep.mubr.msk.f32.mxu0 %vm1776_vm0, %v1775_v6  ;;  %1512 = vmatpush3.msra.mxu0 %v1846_v5  ;;  %v52_v11 = vshrl.u32 %v51_v10, 7  ;;  %v30_v13 = vld [vmem:[%s2222_s3] sm:$0xf]  ;;  %v1910_v35 = vld [vmem:[%s2225_s6 + $0x18] sm:$0xff]  ;;  %v1915_v36 = vld [vmem:[%s2225_s6 + $0x10] sm:$0xff]  ;;  %43 = vst.msk [vmem:[#allocation3] sm:$0xff] %vm42_vm2, %v1833_v0 }
   0x5   :  { %1513 = vmatprep.subr.mxu0 %v1775_v6  ;;  %1530 = vmatprep.mubr.msk.f32.mxu1 %vm1776_vm0, %v1775_v6  ;;  %v1418_v22 = vld [vmem:[%s2220_s1 + $0x1] ss:$0 sm:$0xff]  ;;  %v1922_v37 = vld [vmem:[%s2225_s6 + $0x8] sm:$0xff]  ;;  %v1941_v40 = vld [vmem:[%s2224_s5] ss:$0 sm:$0xff]  ;;  %s1779_s28 = smov 20  }
   0x6   :  { %1694 = vset.pattern.permute.xlu0 %v1773_v3  ;;  %1696 = vset.pattern.permute.xlu1 %v1774_v4  ;;  %v53_v12 = vsub.s32 0, %v52_v11  ;;  %v67_v15 = vsub.s32 1, %v52_v11  ;;  %v77_v17 = vsub.s32 2, %v52_v11  ;;  %v87_v19 = vsub.s32 3, %v52_v11  ;;  %v1929_v38 = vld [vmem:[%s2225_s6] sm:$0xff]  ;;  %s1778_s6 = smov 12  }
   0x7   :  { %62 = vperm.xlu0 %1694, %v1833_v0   ;;  %82 = vperm.xlu1 %1696, %v1833_v0   ;;  %v45_v39 = vld [vmem:[%s2221_s2 + $0x1] sm:$0x1]  ;;  %v1958_v45 = vld [vmem:[%s2226_s7] ss:$0 sm:$0xff]  ;;  %v1423_v53 = vld [vmem:[%s2220_s1 + $0x2] ss:$0 sm:$0xff] }
   0x8   :  { %1514 = vmatpush3.msra.mxu0 %v1853_v7  ;;  %v1881_v14 = vrot.slane %v30_v13, %v53_v12  ;;  %v1884_v21 = vrot.slane %v30_v13, %v67_v15  ;;  %v1889_v23 = vrot.slane %v30_v13, %v77_v17  ;;  %v1891_v24 = vrot.slane %v30_v13, %v87_v19  ;;  %v265_v12 = vld [vmem:[%s2221_s2 + $0x2] sm:$0x1]  ;;  %s1780_s7 = smov 8   ;;  %s1781_s0 = smov 16  }
   0x9   :  { %1515 = vmatprep.subr.mxu0 %v1775_v6  ;;  %1523 = vmatpush3.msra.mxu1 %v1910_v35  ;;  %1665 = vpush %v45_v39  ;;  %s1782_s29 = smov 24   ;;  %vm262_vm3 = vcmask 64544   ;;  %vm452_vm4 = vcmask 97344   ;;  %vm642_vm5 = vcmask 130144   ;;  %vm832_vm6 = vcmask 162944   ;;  %s1783_s12 = smov 28  }
   0xa   :  { %1516 = vmatpush3.msra.mxu0 %v1863_v8  ;;  %1524 = vmatprep.subr.mxu1 %v1775_v6  ;;  %1667 = vpush %v265_v12  ;;  %vm1022_vm7 = vcmask 195744   ;;  %vm1212_vm8 = vcmask 228544   ;;  %vm1402_vm9 = vcmask 261344  }
   0xb   :  { %1697 = vset.pattern.permute.xlu1 %v1771_v1  ;;  %1517 = vmatprep.subr.mxu0 %v1775_v6 }
   0xc   :  { %1518 = vmatpush3.msra.mxu0 %v1872_v9  ;;  %1525 = vmatpush3.msra.mxu1 %v1915_v36 }
   0xd   :  { %1533 = vmatprep.subr.mxu0 %v1775_v6  ;;  %1526 = vmatprep.subr.mxu1 %v1775_v6 }
   0xe   :  { %1527 = vmatpush3.msra.mxu1 %v1922_v37 }
   0xf   :  { %1528 = vmatprep.subr.mxu1 %v1775_v6 }
  0x10   :  { %1529 = vmatpush3.msra.mxu1 %v1929_v38 }
  0x11   :  { %1544 = vmatprep.subr.mxu1 %v1775_v6 }
  0x3a   :  { %s1666_s5 = spop %1665 }
  0x3b   :  { %v254_v47 = vstv %s1666_s5  ;;  %s1668_s9 = spop %1667  ;;  %s1777_s5 = smov 4  }
  0x3c   :  { %v444_v19 = vstv %s1668_s9 }
  0x7d   :  { %v49_v16 = vpop.permute.xlu0 %48  ;;  %v73_v18 = vpop.permute.xlu1 %72 }
  0x7e   :  { %v55_v20 = vmul.f32 %v1881_v14, %v49_v16  ;;  %v79_v29 = vmul.f32 %v1889_v23, %v73_v18 }
  0x80   :  { %v60_v27 = vadd.f32 %v1418_v22, %v55_v20 }
  0x82   :  { %v63_v25 = vpop.permute.xlu0 %62  ;;  %v83_v26 = vpop.permute.xlu1 %82 }
  0x83   :  { %v69_v28 = vmul.f32 %v1884_v21, %v63_v25  ;;  %v89_v31 = vmul.f32 %v1891_v24, %v83_v26 }
  0x85   :  { %v70_v30 = vadd.f32 %v69_v28, %v60_v27 }
  0x87   :  { %v80_v32 = vadd.f32 %v79_v29, %v70_v30  ;;  %v1426_v29 = vld [vmem:[%s2220_s1 + $0x3] ss:$0 sm:$0xff] }
  0x89   :  { %v90_v33 = vadd.f32 %v89_v31, %v80_v32 }
  0x8b   :  { %1721 = vtanh.f32 %v90_v33 }
  0x98   :  { %v1722_v34 = vpop.eup %1721 }
  0x99   :  { %1520 = vmatmul.mubr.msk.f32.vlgmr.msra.gmra.mxu0 %vm98_vm1, %v1722_v34 }
  0x9a   :  { %1534 = vmatpush3.msra.mxu0 %v1846_v5  ;;  %1541 = vmatprep.mubr.msk.f32.mxu0 %vm1776_vm0, %v1775_v6 }
  0x9b   :  { %1535 = vmatprep.subr.mxu0 %v1775_v6 }
  0x9c   :  { %1536 = vmatpush3.msra.mxu0 %v1853_v7 }
  0x9d   :  { %1537 = vmatprep.subr.mxu0 %v1775_v6 }
  0x9e   :  { %1538 = vmatpush3.msra.mxu0 %v1863_v8 }
  0x9f   :  { %1539 = vmatprep.subr.mxu0 %v1775_v6 }
  0xa0   :  { %1540 = vmatpush3.msra.mxu0 %v1872_v9 }
  0xa1   :  { %1555 = vmatprep.subr.mxu0 %v1775_v6 }
 0x159   :  { %v168_v41 = vpop.f32.mrf.mxu0 }
 0x15a   :  { %v169_v42 = vadd.f32 %v1941_v40, %v168_v41 }
 0x15b   :  { %v1521_v43 = vpop.f32.mrf.mxu0 }
 0x15c   :  { %1723 = vtanh.f32 %v169_v42 }
 0x169   :  { %v1724_v44 = vpop.eup %1723 }
 0x16a   :  { %1531 = vmatmul.mubr.msk.f32.vlgmr.msra.gmra.mxu1 %vm98_vm1, %v1724_v44 }
 0x16b   :  { %1545 = vmatpush3.msra.mxu1 %v1910_v35  ;;  %1552 = vmatprep.mubr.msk.f32.mxu1 %vm1776_vm0, %v1775_v6 }
 0x16c   :  { %1546 = vmatprep.subr.mxu1 %v1775_v6 }
 0x16d   :  { %1547 = vmatpush3.msra.mxu1 %v1915_v36 }
 0x16e   :  { %1548 = vmatprep.subr.mxu1 %v1775_v6 }
 0x16f   :  { %1549 = vmatpush3.msra.mxu1 %v1922_v37 }
 0x170   :  { %1550 = vmatprep.subr.mxu1 %v1775_v6 }
 0x171   :  { %1551 = vmatpush3.msra.mxu1 %v1929_v38 }
 0x172   :  { %1566 = vmatprep.subr.mxu1 %v1775_v6 }
 0x22a   :  { %v248_v46 = vpop.f32.mrf.mxu1 }
 0x22b   :  { %v249_v48 = vadd.f32 %v1958_v45, %v248_v46 }
 0x22c   :  { %v1532_v49 = vpop.f32.mrf.mxu1 }
 0x22d   :  { %v256_v50 = vmul.f32 %v254_v47, %v249_v48  ;;  %v455_v47 = vld [vmem:[%s2221_s2 + $0x3] sm:$0x1] }
 0x22e   :  { %1669 = vpush %v455_v47 }
 0x22f   :  { %v1962_v51 = vadd.f32 %v256_v50, %v1833_v0 }
 0x231   :  { %277 = vperm.xlu0 %1694, %v1962_v51   ;;  %267 = vperm.xlu1 %1697, %v1962_v51  }
 0x235   :  { %1699 = vset.pattern.permute.xlu0 %v1774_v4  ;;  %1698 = vset.pattern.permute.xlu1 %v1772_v2 }
 0x236   :  { %289 = vperm.xlu0 %1699, %v1962_v51   ;;  %283 = vperm.xlu1 %1698, %v1962_v51  }
 0x23a   :  { %1702 = vset.pattern.permute.xlu0 %v1772_v2  ;;  %1700 = vset.pattern.permute.xlu1 %v1771_v1 }
 0x25f   :  { %s1670_s14 = spop %1669 }
 0x2ac   :  { %v278_v52 = vpop.permute.xlu0 %277  ;;  %v268_v54 = vpop.permute.xlu1 %267 }
 0x2ad   :  { %v270_v55 = vmul.f32 %v268_v54, %v1881_v14  ;;  %v280_v56 = vmul.f32 %v278_v52, %v1884_v21  ;;  %v634_v54 = vstv %s1670_s14 }
 0x2af   :  { %v275_v57 = vadd.f32 %v1423_v53, %v270_v55 }
 0x2b1   :  { %v290_v58 = vpop.permute.xlu0 %289  ;;  %v281_v59 = vadd.f32 %v280_v56, %v275_v57  ;;  %v284_v60 = vpop.permute.xlu1 %283 }
 0x2b2   :  { %v286_v61 = vmul.f32 %v284_v60, %v1889_v23  ;;  %v292_v62 = vmul.f32 %v290_v58, %v1891_v24 }
 0x2b4   :  { %v287_v63 = vadd.f32 %v286_v61, %v281_v59  ;;  %v1429_v59 = vld [vmem:[%s2220_s1 + $0x4] ss:$0 sm:$0xff] }
 0x2b6   :  { %v293_v10 = vadd.f32 %v292_v62, %v287_v63 }
 0x2b8   :  { %1725 = vtanh.f32 %v293_v10 }
 0x2c5   :  { %v1726_v11 = vpop.eup %1725 }
 0x2c6   :  { %1542 = vmatmul.mubr.msk.f32.vlgmr.msra.gmra.mxu0 %vm98_vm1, %v1726_v11 }
 0x2c7   :  { %1556 = vmatpush3.msra.mxu0 %v1846_v5  ;;  %1563 = vmatprep.mubr.msk.f32.mxu0 %vm1776_vm0, %v1775_v6 }
 0x2c8   :  { %1557 = vmatprep.subr.mxu0 %v1775_v6 }
 0x2c9   :  { %1558 = vmatpush3.msra.mxu0 %v1853_v7 }
 0x2ca   :  { %1559 = vmatprep.subr.mxu0 %v1775_v6 }
 0x2cb   :  { %1560 = vmatpush3.msra.mxu0 %v1863_v8 }
 0x2cc   :  { %1561 = vmatprep.subr.mxu0 %v1775_v6 }
 0x2cd   :  { %1562 = vmatpush3.msra.mxu0 %v1872_v9 }
 0x2ce   :  { %1577 = vmatprep.subr.mxu0 %v1775_v6 }
 0x386   :  { %v364_v13 = vpop.f32.mrf.mxu0 }
 0x387   :  { %v365_v15 = vadd.f32 %v1941_v40, %v364_v13 }
 0x388   :  { %v1543_v16 = vpop.f32.mrf.mxu0 }
 0x389   :  { %1727 = vtanh.f32 %v365_v15 }
 0x396   :  { %v1728_v17 = vpop.eup %1727 }
 0x397   :  { %1553 = vmatmul.mubr.msk.f32.vlgmr.msra.gmra.mxu1 %vm98_vm1, %v1728_v17 }
 0x398   :  { %1567 = vmatpush3.msra.mxu1 %v1910_v35  ;;  %1574 = vmatprep.mubr.msk.f32.mxu1 %vm1776_vm0, %v1775_v6 }
 0x399   :  { %1568 = vmatprep.subr.mxu1 %v1775_v6 }
 0x39a   :  { %1569 = vmatpush3.msra.mxu1 %v1915_v36 }
 0x39b   :  { %1570 = vmatprep.subr.mxu1 %v1775_v6 }
 0x39c   :  { %1571 = vmatpush3.msra.mxu1 %v1922_v37 }
 0x39d   :  { %1572 = vmatprep.subr.mxu1 %v1775_v6 }
 0x39e   :  { %1573 = vmatpush3.msra.mxu1 %v1929_v38 }
 0x39f   :  { %1588 = vmatprep.subr.mxu1 %v1775_v6 }
 0x457   :  { %v438_v18 = vpop.f32.mrf.mxu1 }
 0x458   :  { %v439_v20 = vadd.f32 %v1958_v45, %v438_v18 }
 0x459   :  { %v1554_v22 = vpop.f32.mrf.mxu1 }
 0x45a   :  { %v446_v25 = vmul.f32 %v444_v19, %v439_v20  ;;  %v645_v20 = vld [vmem:[%s2221_s2 + $0x4] sm:$0x1] }
 0x45b   :  { %1671 = vpush %v645_v20 }
 0x45c   :  { %v2007_v26 = vadd.f32 %v446_v25, %v1962_v51 }
 0x45e   :  { %473 = vperm.xlu0 %1702, %v2007_v26   ;;  %457 = vperm.xlu1 %1700, %v2007_v26  }
 0x462   :  { %1701 = vset.pattern.permute.xlu1 %v1773_v3  ;;  %1705 = vset.pattern.permute.xlu0 %v1773_v3 }
 0x463   :  { %467 = vperm.xlu1 %1701, %v2007_v26  }
 0x467   :  { %1703 = vset.pattern.permute.xlu1 %v1774_v4 }
 0x468   :  { %479 = vperm.xlu1 %1703, %v2007_v26  }
 0x46c   :  { %1704 = vset.pattern.permute.xlu1 %v1771_v1 }
 0x48c   :  { %s1672_s17 = spop %1671 }
 0x4d9   :  { %v458_v27 = vpop.permute.xlu1 %457  ;;  %v474_v30 = vpop.permute.xlu0 %473 }
 0x4da   :  { %v460_v28 = vmul.f32 %v458_v27, %v1881_v14  ;;  %v476_v34 = vmul.f32 %v474_v30, %v1889_v23  ;;  %v824_v30 = vstv %s1672_s17 }
 0x4dc   :  { %v465_v32 = vadd.f32 %v1426_v29, %v460_v28 }
 0x4de   :  { %v468_v31 = vpop.permute.xlu1 %467 }
 0x4df   :  { %v470_v33 = vmul.f32 %v468_v31, %v1884_v21 }
 0x4e1   :  { %v471_v39 = vadd.f32 %v470_v33, %v465_v32 }
 0x4e3   :  { %v477_v41 = vadd.f32 %v476_v34, %v471_v39  ;;  %v480_v42 = vpop.permute.xlu1 %479 }
 0x4e4   :  { %v482_v43 = vmul.f32 %v480_v42, %v1891_v24 }
 0x4e6   :  { %v483_v44 = vadd.f32 %v482_v43, %v477_v41  ;;  %v1432_v41 = vld [vmem:[%s2220_s1 + $0x5] ss:$0 sm:$0xff] }
 0x4e8   :  { %1729 = vtanh.f32 %v483_v44 }
 0x4f5   :  { %v1730_v46 = vpop.eup %1729 }
 0x4f6   :  { %1564 = vmatmul.mubr.msk.f32.vlgmr.msra.gmra.mxu0 %vm98_vm1, %v1730_v46 }
 0x4f7   :  { %1578 = vmatpush3.msra.mxu0 %v1846_v5  ;;  %1585 = vmatprep.mubr.msk.f32.mxu0 %vm1776_vm0, %v1775_v6 }
 0x4f8   :  { %1579 = vmatprep.subr.mxu0 %v1775_v6 }
 0x4f9   :  { %1580 = vmatpush3.msra.mxu0 %v1853_v7 }
 0x4fa   :  { %1581 = vmatprep.subr.mxu0 %v1775_v6 }
 0x4fb   :  { %1582 = vmatpush3.msra.mxu0 %v1863_v8 }
 0x4fc   :  { %1583 = vmatprep.subr.mxu0 %v1775_v6 }
 0x4fd   :  { %1584 = vmatpush3.msra.mxu0 %v1872_v9 }
 0x4fe   :  { %1599 = vmatprep.subr.mxu0 %v1775_v6 }
 0x5b6   :  { %v554_v48 = vpop.f32.mrf.mxu0 }
 0x5b7   :  { %v555_v49 = vadd.f32 %v1941_v40, %v554_v48 }
 0x5b8   :  { %v1565_v50 = vpop.f32.mrf.mxu0 }
 0x5b9   :  { %1731 = vtanh.f32 %v555_v49 }
 0x5c6   :  { %v1732_v52 = vpop.eup %1731 }
 0x5c7   :  { %1575 = vmatmul.mubr.msk.f32.vlgmr.msra.gmra.mxu1 %vm98_vm1, %v1732_v52 }
 0x5c8   :  { %1589 = vmatpush3.msra.mxu1 %v1910_v35  ;;  %1596 = vmatprep.mubr.msk.f32.mxu1 %vm1776_vm0, %v1775_v6 }
 0x5c9   :  { %1590 = vmatprep.subr.mxu1 %v1775_v6 }
 0x5ca   :  { %1591 = vmatpush3.msra.mxu1 %v1915_v36 }
 0x5cb   :  { %1592 = vmatprep.subr.mxu1 %v1775_v6 }
 0x5cc   :  { %1593 = vmatpush3.msra.mxu1 %v1922_v37 }
 0x5cd   :  { %1594 = vmatprep.subr.mxu1 %v1775_v6 }
 0x5ce   :  { %1595 = vmatpush3.msra.mxu1 %v1929_v38 }
 0x5cf   :  { %1610 = vmatprep.subr.mxu1 %v1775_v6 }
 0x687   :  { %v628_v53 = vpop.f32.mrf.mxu1 }
 0x688   :  { %v629_v55 = vadd.f32 %v1958_v45, %v628_v53 }
 0x689   :  { %v1576_v56 = vpop.f32.mrf.mxu1 }
 0x68a   :  { %v636_v57 = vmul.f32 %v634_v54, %v629_v55  ;;  %v835_v56 = vld [vmem:[%s2221_s2 + $0x5] sm:$0x1] }
 0x68b   :  { %1673 = vpush %v835_v56 }
 0x68c   :  { %v2052_v58 = vadd.f32 %v636_v57, %v2007_v26 }
 0x68e   :  { %657 = vperm.xlu0 %1705, %v2052_v58   ;;  %647 = vperm.xlu1 %1704, %v2052_v58  }
 0x692   :  { %1706 = vset.pattern.permute.xlu1 %v1772_v2  ;;  %1708 = vset.pattern.permute.xlu0 %v1771_v1 }
 0x693   :  { %663 = vperm.xlu1 %1706, %v2052_v58  }
 0x697   :  { %1707 = vset.pattern.permute.xlu1 %v1774_v4 }
 0x698   :  { %669 = vperm.xlu1 %1707, %v2052_v58  }
 0x69c   :  { %1709 = vset.pattern.permute.xlu1 %v1773_v3 }
 0x6bc   :  { %s1674_s22 = spop %1673 }
 0x709   :  { %v648_v60 = vpop.permute.xlu1 %647  ;;  %v658_v62 = vpop.permute.xlu0 %657 }
 0x70a   :  { %v650_v61 = vmul.f32 %v648_v60, %v1881_v14  ;;  %v660_v10 = vmul.f32 %v658_v62, %v1884_v21 }
 0x70c   :  { %v655_v63 = vadd.f32 %v1429_v59, %v650_v61 }
 0x70e   :  { %v664_v11 = vpop.permute.xlu1 %663  ;;  %v661_v12 = vadd.f32 %v660_v10, %v655_v63  ;;  %v1014_v63 = vstv %s1674_s22 }
 0x70f   :  { %v666_v13 = vmul.f32 %v664_v11, %v1889_v23 }
 0x711   :  { %v667_v16 = vadd.f32 %v666_v13, %v661_v12 }
 0x713   :  { %v670_v15 = vpop.permute.xlu1 %669 }
 0x714   :  { %v672_v17 = vmul.f32 %v670_v15, %v1891_v24 }
 0x716   :  { %v673_v18 = vadd.f32 %v672_v17, %v667_v16  ;;  %v1435_v17 = vld [vmem:[%s2220_s1 + $0x6] ss:$0 sm:$0xff] }
 0x718   :  { %1733 = vtanh.f32 %v673_v18 }
 0x725   :  { %v1734_v19 = vpop.eup %1733 }
 0x726   :  { %1586 = vmatmul.mubr.msk.f32.vlgmr.msra.gmra.mxu0 %vm98_vm1, %v1734_v19 }
 0x727   :  { %1600 = vmatpush3.msra.mxu0 %v1846_v5  ;;  %1607 = vmatprep.mubr.msk.f32.mxu0 %vm1776_vm0, %v1775_v6 }
 0x728   :  { %1601 = vmatprep.subr.mxu0 %v1775_v6 }
 0x729   :  { %1602 = vmatpush3.msra.mxu0 %v1853_v7 }
 0x72a   :  { %1603 = vmatprep.subr.mxu0 %v1775_v6 }
 0x72b   :  { %1604 = vmatpush3.msra.mxu0 %v1863_v8 }
 0x72c   :  { %1605 = vmatprep.subr.mxu0 %v1775_v6 }
 0x72d   :  { %1606 = vmatpush3.msra.mxu0 %v1872_v9 }
 0x72e   :  { %1621 = vmatprep.subr.mxu0 %v1775_v6 }
 0x7e6   :  { %v744_v22 = vpop.f32.mrf.mxu0 }
 0x7e7   :  { %v745_v25 = vadd.f32 %v1941_v40, %v744_v22 }
 0x7e8   :  { %v1587_v27 = vpop.f32.mrf.mxu0 }
 0x7e9   :  { %1735 = vtanh.f32 %v745_v25 }
 0x7f6   :  { %v1736_v28 = vpop.eup %1735 }
 0x7f7   :  { %1597 = vmatmul.mubr.msk.f32.vlgmr.msra.gmra.mxu1 %vm98_vm1, %v1736_v28 }
 0x7f8   :  { %1611 = vmatpush3.msra.mxu1 %v1910_v35  ;;  %1618 = vmatprep.mubr.msk.f32.mxu1 %vm1776_vm0, %v1775_v6 }
 0x7f9   :  { %1612 = vmatprep.subr.mxu1 %v1775_v6 }
 0x7fa   :  { %1613 = vmatpush3.msra.mxu1 %v1915_v36 }
 0x7fb   :  { %1614 = vmatprep.subr.mxu1 %v1775_v6 }
 0x7fc   :  { %1615 = vmatpush3.msra.mxu1 %v1922_v37 }
 0x7fd   :  { %1616 = vmatprep.subr.mxu1 %v1775_v6 }
 0x7fe   :  { %1617 = vmatpush3.msra.mxu1 %v1929_v38 }
 0x7ff   :  { %1632 = vmatprep.subr.mxu1 %v1775_v6 }
 0x8b7   :  { %v818_v29 = vpop.f32.mrf.mxu1 }
 0x8b8   :  { %v819_v31 = vadd.f32 %v1958_v45, %v818_v29 }
 0x8b9   :  { %v1598_v32 = vpop.f32.mrf.mxu1 }
 0x8ba   :  { %v826_v33 = vmul.f32 %v824_v30, %v819_v31  ;;  %v1025_v31 = vld [vmem:[%s2221_s2 + $0x6] sm:$0x1] }
 0x8bb   :  { %1675 = vpush %v1025_v31 }
 0x8bc   :  { %v2097_v34 = vadd.f32 %v826_v33, %v2052_v58 }
 0x8be   :  { %847 = vperm.xlu1 %1709, %v2097_v34   ;;  %837 = vperm.xlu0 %1708, %v2097_v34  }
 0x8c2   :  { %1710 = vset.pattern.permute.xlu1 %v1772_v2  ;;  %1711 = vset.pattern.permute.xlu0 %v1774_v4 }
 0x8c3   :  { %853 = vperm.xlu1 %1710, %v2097_v34   ;;  %859 = vperm.xlu0 %1711, %v2097_v34  }
 0x8c7   :  { %1712 = vset.pattern.permute.xlu1 %v1771_v1  ;;  %1714 = vset.pattern.permute.xlu0 %v1772_v2 }
 0x8ec   :  { %s1676_s27 = spop %1675 }
 0x939   :  { %v848_v39 = vpop.permute.xlu1 %847  ;;  %v838_v42 = vpop.permute.xlu0 %837 }
 0x93a   :  { %v840_v43 = vmul.f32 %v838_v42, %v1881_v14  ;;  %v850_v44 = vmul.f32 %v848_v39, %v1884_v21 }
 0x93c   :  { %v845_v46 = vadd.f32 %v1432_v41, %v840_v43 }
 0x93e   :  { %v854_v47 = vpop.permute.xlu1 %853  ;;  %v851_v48 = vadd.f32 %v850_v44, %v845_v46  ;;  %v860_v49 = vpop.permute.xlu0 %859 }
 0x93f   :  { %v856_v50 = vmul.f32 %v854_v47, %v1889_v23  ;;  %v862_v53 = vmul.f32 %v860_v49, %v1891_v24 }
 0x941   :  { %v857_v52 = vadd.f32 %v856_v50, %v851_v48 }
 0x943   :  { %v863_v54 = vadd.f32 %v862_v53, %v857_v52 }
 0x945   :  { %1737 = vtanh.f32 %v863_v54 }
 0x952   :  { %v1738_v55 = vpop.eup %1737 }
 0x953   :  { %1608 = vmatmul.mubr.msk.f32.vlgmr.msra.gmra.mxu0 %vm98_vm1, %v1738_v55 }
 0x954   :  { %1622 = vmatpush3.msra.mxu0 %v1846_v5  ;;  %1629 = vmatprep.mubr.msk.f32.mxu0 %vm1776_vm0, %v1775_v6 }
 0x955   :  { %1623 = vmatprep.subr.mxu0 %v1775_v6 }
 0x956   :  { %1624 = vmatpush3.msra.mxu0 %v1853_v7 }
 0x957   :  { %1625 = vmatprep.subr.mxu0 %v1775_v6 }
 0x958   :  { %1626 = vmatpush3.msra.mxu0 %v1863_v8 }
 0x959   :  { %1627 = vmatprep.subr.mxu0 %v1775_v6 }
 0x95a   :  { %1628 = vmatpush3.msra.mxu0 %v1872_v9 }
 0x95b   :  { %1643 = vmatprep.subr.mxu0 %v1775_v6 }
 0xa13   :  { %v934_v57 = vpop.f32.mrf.mxu0 }
 0xa14   :  { %v935_v59 = vadd.f32 %v1941_v40, %v934_v57 }
 0xa15   :  { %v1609_v60 = vpop.f32.mrf.mxu0 }
 0xa16   :  { %1739 = vtanh.f32 %v935_v59 }
 0xa23   :  { %v1740_v61 = vpop.eup %1739 }
 0xa24   :  { %1619 = vmatmul.mubr.msk.f32.vlgmr.msra.gmra.mxu1 %vm98_vm1, %v1740_v61 }
 0xa25   :  { %1633 = vmatpush3.msra.mxu1 %v1910_v35  ;;  %1640 = vmatprep.mubr.msk.f32.mxu1 %vm1776_vm0, %v1775_v6 }
 0xa26   :  { %1634 = vmatprep.subr.mxu1 %v1775_v6 }
 0xa27   :  { %1635 = vmatpush3.msra.mxu1 %v1915_v36 }
 0xa28   :  { %1636 = vmatprep.subr.mxu1 %v1775_v6 }
 0xa29   :  { %1637 = vmatpush3.msra.mxu1 %v1922_v37 }
 0xa2a   :  { %1638 = vmatprep.subr.mxu1 %v1775_v6 }
 0xa2b   :  { %1639 = vmatpush3.msra.mxu1 %v1929_v38 }
 0xa2c   :  { %1654 = vmatprep.subr.mxu1 %v1775_v6 }
 0xae4   :  { %v1008_v62 = vpop.f32.mrf.mxu1 }
 0xae5   :  { %v1009_v10 = vadd.f32 %v1958_v45, %v1008_v62 }
 0xae6   :  { %v1620_v11 = vpop.f32.mrf.mxu1 }
 0xae7   :  { %v1016_v12 = vmul.f32 %v1014_v63, %v1009_v10 }
 0xae9   :  { %v2142_v13 = vadd.f32 %v1016_v12, %v2097_v34 }
 0xaeb   :  { %1043 = vperm.xlu0 %1714, %v2142_v13   ;;  %1027 = vperm.xlu1 %1712, %v2142_v13  }
 0xaef   :  { %1713 = vset.pattern.permute.xlu1 %v1773_v3  ;;  %1717 = vset.pattern.permute.xlu0 %v1773_v3 }
 0xaf0   :  { %1037 = vperm.xlu1 %1713, %v2142_v13  }
 0xaf4   :  { %1715 = vset.pattern.permute.xlu1 %v1774_v4 }
 0xaf5   :  { %1049 = vperm.xlu1 %1715, %v2142_v13  }
 0xaf9   :  { %1716 = vset.pattern.permute.xlu1 %v1771_v1 }
 0xb66   :  { %v1028_v15 = vpop.permute.xlu1 %1027  ;;  %v1044_v18 = vpop.permute.xlu0 %1043 }
 0xb67   :  { %v1030_v16 = vmul.f32 %v1028_v15, %v1881_v14  ;;  %v1046_v22 = vmul.f32 %v1044_v18, %v1889_v23 }
 0xb69   :  { %v1035_v20 = vadd.f32 %v1435_v17, %v1030_v16 }
 0xb6b   :  { %v1038_v19 = vpop.permute.xlu1 %1037 }
 0xb6c   :  { %v1040_v3 = vmul.f32 %v1038_v19, %v1884_v21 }
 0xb6e   :  { %v1041_v25 = vadd.f32 %v1040_v3, %v1035_v20 }
 0xb70   :  { %v1047_v27 = vadd.f32 %v1046_v22, %v1041_v25  ;;  %v1050_v28 = vpop.permute.xlu1 %1049 }
 0xb71   :  { %v1052_v29 = vmul.f32 %v1050_v28, %v1891_v24 }
 0xb73   :  { %v1053_v1 = vadd.f32 %v1052_v29, %v1047_v27 }
 0xb75   :  { %1741 = vtanh.f32 %v1053_v1 }
 0xb82   :  { %v1742_v30 = vpop.eup %1741 }
 0xb83   :  { %1630 = vmatmul.mubr.msk.f32.vlgmr.msra.gmra.mxu0 %vm98_vm1, %v1742_v30 }
 0xb84   :  { %1644 = vmatpush3.msra.mxu0 %v1846_v5  ;;  %1651 = vmatprep.mubr.msk.f32.mxu0 %vm1776_vm0, %v1775_v6 }
 0xb85   :  { %1645 = vmatprep.subr.mxu0 %v1775_v6 }
 0xb86   :  { %1646 = vmatpush3.msra.mxu0 %v1853_v7 }
 0xb87   :  { %1647 = vmatprep.subr.mxu0 %v1775_v6 }
 0xb88   :  { %1648 = vmatpush3.msra.mxu0 %v1863_v8  ;;  %v1204_v8 = vstv %s1676_s27 }
 0xb89   :  { %1649 = vmatprep.subr.mxu0 %v1775_v6 }
 0xb8a   :  { %1650 = vmatpush3.msra.mxu0 %v1872_v9 }
 0xc43   :  { %v1124_v5 = vpop.f32.mrf.mxu0 }
 0xc44   :  { %v1125_v32 = vadd.f32 %v1941_v40, %v1124_v5 }
 0xc45   :  { %v1631_v33 = vpop.f32.mrf.mxu0 }
 0xc46   :  { %1743 = vtanh.f32 %v1125_v32 }
 0xc53   :  { %v1744_v39 = vpop.eup %1743 }
 0xc54   :  { %1641 = vmatmul.mubr.msk.f32.vlgmr.msra.gmra.mxu1 %vm98_vm1, %v1744_v39 }
 0xc55   :  { %1655 = vmatpush3.msra.mxu1 %v1910_v35  ;;  %1662 = vmatprep.mubr.msk.f32.mxu1 %vm1776_vm0, %v1775_v6 }
 0xc56   :  { %1656 = vmatprep.subr.mxu1 %v1775_v6 }
 0xc57   :  { %1657 = vmatpush3.msra.mxu1 %v1915_v36 }
 0xc58   :  { %1658 = vmatprep.subr.mxu1 %v1775_v6 }
 0xc59   :  { %1659 = vmatpush3.msra.mxu1 %v1922_v37 }
 0xc5a   :  { %1660 = vmatprep.subr.mxu1 %v1775_v6 }
 0xc5b   :  { %1661 = vmatpush3.msra.mxu1 %v1929_v38 }
 0xd14   :  { %v1198_v7 = vpop.f32.mrf.mxu1 }
 0xd15   :  { %v1199_v9 = vadd.f32 %v1958_v45, %v1198_v7 }
 0xd16   :  { %v1642_v35 = vpop.f32.mrf.mxu1 }
 0xd17   :  { %v1206_v41 = vmul.f32 %v1204_v8, %v1199_v9 }
 0xd19   :  { %v2185_v42 = vadd.f32 %v1206_v41, %v2142_v13 }
 0xd1b   :  { %1227 = vperm.xlu0 %1717, %v2185_v42   ;;  %1217 = vperm.xlu1 %1716, %v2185_v42  }
 0xd1f   :  { %259 = vrot.lane.b32.xlu0 %v1962_v51, %s1777_s5  ;;  %1718 = vset.pattern.permute.xlu1 %v1772_v2  ;;  %v1438_v2 = vld [vmem:[%s2220_s1 + $0x7] ss:$0 sm:$0xff] }
 0xd20   :  { %1233 = vperm.xlu1 %1718, %v2185_v42   ;;  %1720 = vset.pattern.permute.xlu0 %v1774_v4 }
 0xd23   :  { %639 = vrot.lane.b32.xlu0 %v2052_v58, %s1778_s6 }
 0xd24   :  { %1719 = vset.pattern.permute.xlu1 %v1774_v4 }
 0xd25   :  { %1239 = vperm.xlu1 %1719, %v2185_v42  }
 0xd27   :  { %1019 = vrot.lane.b32.xlu0 %v2142_v13, %s1779_s28 }
 0xd29   :  { %449 = vrot.lane.b32.xlu1 %v2007_v26, %s1780_s7 }
 0xd2d   :  { %829 = vrot.lane.b32.xlu1 %v2097_v34, %s1781_s0 }
 0xd31   :  { %1209 = vrot.lane.b32.xlu1 %v2185_v42, %s1782_s29 }
 0xd96   :  { %v1228_v0 = vpop.permute.xlu0 %1227  ;;  %v1218_v4 = vpop.permute.xlu1 %1217 }
 0xd97   :  { %v1220_v6 = vmul.f32 %v1218_v4, %v1881_v14  ;;  %v1230_v38 = vmul.f32 %v1228_v0, %v1884_v21 }
 0xd99   :  { %v1225_v36 = vadd.f32 %v1438_v2, %v1220_v6 }
 0xd9a   :  { %v260_v37 = vpop.permute.xlu0 %259 }
 0xd9b   :  { %263 = vst.msk [vmem:[#allocation3] sm:$0xff] %vm262_vm3, %v260_v37  ;;  %v1234_v51 = vpop.permute.xlu1 %1233  ;;  %v1231_v26 = vadd.f32 %v1230_v38, %v1225_v36 }
 0xd9c   :  { %v1236_v58 = vmul.f32 %v1234_v51, %v1889_v23 }
 0xd9e   :  { %v1237_v43 = vadd.f32 %v1236_v58, %v1231_v26  ;;  %v640_v46 = vpop.permute.xlu0 %639 }
 0xda0   :  { %v1240_v34 = vpop.permute.xlu1 %1239 }
 0xda1   :  { %v1242_v44 = vmul.f32 %v1240_v34, %v1891_v24  ;;  %v1215_v24 = vld [vmem:[%s2221_s2 + $0x7] sm:$0x1]  ;;  %s1784_s2 = smov [#allocation3]  }
 0xda2   :  { %v1020_v21 = vpop.permute.xlu0 %1019  ;;  %1677 = vpush %v1215_v24  ;;  %s1410_s13 = sshll.u32 %s1784_s2, 4  ;;  %s1411_s13 = int_to_ptr.vmem [resolvable:$true] %s1410_s13 }
 0xda3   :  { %v1243_v47 = vadd.f32 %v1242_v44, %v1237_v43  ;;  %s1749_s14 = scalar_lea.vmem %s1411_s13, 128  ;;  %p1754_p1 = scmp.lt.s32.totalorder %s1411_s13, %s1411_s13 }
 0xda4   :  { %v450_v48 = vpop.permute.xlu1 %449  ;;  %p1750_p0 = scmp.ne.s32.totalorder %s1411_s13, %s1749_s14  ;;  %p1755_p2 = scmp.lt.s32.totalorder %s1749_s14, %s1749_s14 }
 0xda5   :  { %1745 = vtanh.f32 %v1243_v47  ;;  %453 = vst.msk [vmem:[#allocation3] sm:$0xff] %vm452_vm4, %v450_v48 }
 0xda6   :  { %643 = vst.msk [vmem:[#allocation3] sm:$0xff] %vm642_vm5, %v640_v46  ;;  %p1756_p3 = por %p1755_p2, %p1754_p1 }
 0xda8   :  { %v830_v14 = vpop.permute.xlu1 %829  ;;  %p1757_p4 = pnand %p1756_p3, %p1750_p0 }
 0xda9   :  { %833 = vst.msk [vmem:[#allocation3] sm:$0xff] %vm832_vm6, %v830_v14 }
 0xdaa   :  { %1023 = vst.msk [vmem:[#allocation3] sm:$0xff] %vm1022_vm7, %v1020_v21 }
 0xdac   :  { %v1210_v23 = vpop.permute.xlu1 %1209 }
 0xdad   :  { %1213 = vst.msk [vmem:[#allocation3] sm:$0xff] %vm1212_vm8, %v1210_v23 }
 0xdb2   :  { %v1746_v49 = vpop.eup %1745 }
 0xdb3   :  { %1652 = vmatmul.mubr.msk.f32.vlgmr.msra.gmra.mxu0 %vm98_vm1, %v1746_v49 }
 0xdd3   :  { %s1678_s11 = spop %1677 }
 0xdd4   :  { %v1394_v56 = vstv %s1678_s11 }
 0xe73   :  { %v1314_v50 = vpop.f32.mrf.mxu0 }
 0xe74   :  { %v1315_v52 = vadd.f32 %v1941_v40, %v1314_v50 }
 0xe75   :  { %v1653_v53 = vpop.f32.mrf.mxu0 }
 0xe76   :  { %1747 = vtanh.f32 %v1315_v52 }
 0xe83   :  { %v1748_v54 = vpop.eup %1747 }
 0xe84   :  { %1663 = vmatmul.mubr.msk.f32.vlgmr.msra.gmra.mxu1 %vm98_vm1, %v1748_v54 }
 0xf44   :  { %v1388_v55 = vpop.f32.mrf.mxu1 }
 0xf45   :  { %v1389_v57 = vadd.f32 %v1958_v45, %v1388_v55 }
 0xf46   :  { %v1664_v59 = vpop.f32.mrf.mxu1 }
 0xf47   :  { %v1396_v60 = vmul.f32 %v1394_v56, %v1389_v57 }
 0xf49   :  { %v1397_v61 = vadd.f32 %v1396_v60, %v2185_v42 }
 0xf4b   :  { %1399 = vrot.lane.b32.xlu0 %v1397_v61, %s1783_s12 }
 0xfbd   :  { %v1400_v40 = vpop.permute.xlu0 %1399 }
 0xfbe   :  { %1403 = vst.msk [vmem:[#allocation3] sm:$0xff] %vm1402_vm9, %v1400_v40 }
 0xfbf   :  { %1760 = shalt.err (!%p1757_p4)
}
 0xfc0   :  { %1413 = dma.vmem_to_hbm [thread:$0]  %s1411_s13, 128, %s2227_s8, [#allocation4]  }
 0xfc1   :  { %1769 = dma.done.wait [#allocation4], 128  }
 0xfc2   :  { %1770 = vsyncadd [#allocation4], 4294967168 }
 0xfc3   :  { %1417 = vsyncpa [#allocation4], 1 }

</bundles_post_ra>
